<compile_context>
chip_gen: v6e
topology: v6e:2x2x1
jax: 0.10.0
libtpu: 0.0.40
codegen_flags: <defaults>
</compile_context>

<pallas_src>
import functools

import jax
import jax.numpy as jnp
from jax.experimental import pallas as pl
from jax.experimental.pallas import tpu as pltpu

# ---- module hyper-params (from the PyTorch source) -------------------------
dimS = 5
dimX = 3 + 1          # "dimX = dimX + 1" with a base dimX of 3
D_IN = dimX + dimS    # 9
H1 = 50               # numneuron
H2 = 10
D_OUT = 1

_LANE = 128
_TB_MAX = 1024        # batch tile (rows on the lane axis); 9*TB*4B << VMEM


def _round_up(n, m):
    return ((n + m - 1) // m) * m


# ---- Pallas kernel ----------------------------------------------------------
def _net_kernel(x_ref, w1_ref, b1_ref, w2_ref, b2_ref, w3_ref, b3_ref, o_ref):
    x = x_ref[...]                                              # (D_IN, TB)

    # fc1 + relu : (H1, D_IN) @ (D_IN, TB) -> (H1, TB)
    h1 = jnp.dot(w1_ref[...], x, preferred_element_type=jnp.float32) + b1_ref[...]
    h1 = jnp.maximum(h1, 0.0)

    # fc2 + relu : (H2, H1) @ (H1, TB) -> (H2, TB)
    h2 = jnp.dot(w2_ref[...], h1, preferred_element_type=jnp.float32) + b2_ref[...]
    h2 = jnp.maximum(h2, 0.0)

    # fc3 + softplus (torch semantics: linear above threshold=20)
    z = jnp.dot(w3_ref[...], h2, preferred_element_type=jnp.float32) + b3_ref[...]
    sp = jnp.log1p(jnp.exp(jnp.minimum(z, 20.0)))
    o_ref[...] = jnp.where(z > 20.0, z, sp)                     # (D_OUT, TB)


@functools.partial(jax.jit, static_argnames=("tb_max",))
def net_forward(x, params, *, tb_max=_TB_MAX):
    """x: (B, D_IN) float32. params: w1 (H1,D_IN), b1 (H1,1), w2 (H2,H1),
    b2 (H2,1), w3 (D_OUT,H2), b3 (D_OUT,1).  Returns (B, D_OUT)."""
    B = x.shape[0]

    # Batch tile: multiple of 128 lanes, capped at tb_max.
    TB = min(tb_max, _round_up(max(B, 1), _LANE))
    grid = pl.cdiv(B, TB)
    B_pad = grid * TB

    # Feature-major layout: batch on the lane axis.  Pad batch to B_pad
    # (zero rows -> finite softplus values, sliced off below).
    xT = x.T                                                    # (D_IN, B)
    if B_pad != B:
        xT = jnp.pad(xT, ((0, 0), (0, B_pad - B)))

    const = lambda i: (0, 0)      # weights/biases: resident, never re-fetched
    cost = pl.CostEstimate(
        flops=2 * B_pad * (D_IN * H1 + H1 * H2 + H2 * D_OUT),
        transcendentals=2 * B_pad,                # exp + log1p per row
        bytes_accessed=4 * B_pad * (D_IN + D_OUT)
        + 4 * (H1 * D_IN + H1 + H2 * H1 + H2 + D_OUT * H2 + D_OUT),
    )

    out_t = pl.pallas_call(
        _net_kernel,
        out_shape=jax.ShapeDtypeStruct((D_OUT, B_pad), jnp.float32),
        grid=(grid,),
        in_specs=[
            pl.BlockSpec((D_IN, TB), lambda i: (0, i)),         # xT tile
            pl.BlockSpec((H1, D_IN), const),                    # w1
            pl.BlockSpec((H1, 1), const),                       # b1
            pl.BlockSpec((H2, H1), const),                      # w2
            pl.BlockSpec((H2, 1), const),                       # b2
            pl.BlockSpec((D_OUT, H2), const),                   # w3
            pl.BlockSpec((D_OUT, 1), const),                    # b3
        ],
        out_specs=pl.BlockSpec((D_OUT, TB), lambda i: (0, i)),  # lane-dense
        compiler_params=pltpu.CompilerParams(
            dimension_semantics=("parallel",),
        ),
        cost_estimate=cost,
    )(xT, params["w1"], params["b1"], params["w2"], params["b2"],
      params["w3"], params["b3"])

    return out_t[:, :B].T                                       # (B, D_OUT)


# ---- deterministic parameter init (torch.nn.Linear-style uniform) ----------
def init_params(key):
    def linear(key, fan_in, fan_out):
        kw, kb = jax.random.split(key)
        bound = 1.0 / jnp.sqrt(float(fan_in))
        # feature-major storage: W is (out, in), b is (out, 1)
        w = jax.random.uniform(kw, (fan_out, fan_in), jnp.float32, -bound, bound)
        b = jax.random.uniform(kb, (fan_out, 1), jnp.float32, -bound, bound)
        return w, b

    k1, k2, k3 = jax.random.split(key, 3)
    w1, b1 = linear(k1, D_IN, H1)
    w2, b2 = linear(k2, H1, H2)
    w3, b3 = linear(k3, H2, D_OUT)
    return dict(w1=w1, b1=b1, w2=w2, b2=b2, w3=w3, b3=b3)


def _ref(x, p):
    h1 = jnp.maximum(x @ p["w1"].T + p["b1"].T, 0.0)
    h2 = jnp.maximum(h1 @ p["w2"].T + p["b2"].T, 0.0)
    z = h2 @ p["w3"].T + p["b3"].T
    return jnp.where(z > 20.0, z, jnp.log1p(jnp.exp(jnp.minimum(z, 20.0))))


if __name__ == "__main__":
    key = jax.random.PRNGKey(0)
    kx1, kx2, kp = jax.random.split(key, 3)
    params = init_params(kp)

    ok = True
    # small batch (padded to one 128-lane tile) and a multi-tile, non-aligned batch
    for kx, B in ((kx1, 8), (kx2, 2500)):
        x = jax.random.normal(kx, (B, D_IN), jnp.float32)
        out = jax.block_until_ready(net_forward(x, params))
        assert out.shape == (B, D_OUT)
        assert bool(jnp.all(out > 0.0))                 # softplus positivity
        r = _ref(x, params)
        ok = ok and bool(jnp.allclose(out, r, atol=1e-5, rtol=1e-5))

    assert ok
    print("KERNEL_OK")
</pallas_src>

<mosaic_0001>
module attributes {stable_mosaic.version = 11 : i64} {
  func.func @_net_kernel(%arg0: i32, %arg1: memref<9x128xf32, #tpu.memory_space<vmem>>, %arg2: memref<50x9xf32, #tpu.memory_space<vmem>>, %arg3: memref<50x1xf32, #tpu.memory_space<vmem>>, %arg4: memref<10x50xf32, #tpu.memory_space<vmem>>, %arg5: memref<10x1xf32, #tpu.memory_space<vmem>>, %arg6: memref<1x10xf32, #tpu.memory_space<vmem>>, %arg7: memref<1x1xf32, #tpu.memory_space<vmem>>, %arg8: memref<1x128xf32, #tpu.memory_space<vmem>>) attributes {dimension_semantics = [#tpu.dimension_semantics<parallel>], iteration_bounds = array<i64: 1>, scalar_prefetch = 0 : i64, scratch_operands = 0 : i64, tpu.core_type = #tpu.core_type<tc>, window_params = [{transform_indices = @transform_0, window_bounds = array<i64: 9, 128>}, {pipeline_mode = #tpu.pipeline_mode<synchronous>, transform_indices = @transform_1, window_bounds = array<i64: 50, 9>}, {pipeline_mode = #tpu.pipeline_mode<synchronous>, transform_indices = @transform_2, window_bounds = array<i64: 50, 1>}, {pipeline_mode = #tpu.pipeline_mode<synchronous>, transform_indices = @transform_3, window_bounds = array<i64: 10, 50>}, {pipeline_mode = #tpu.pipeline_mode<synchronous>, transform_indices = @transform_4, window_bounds = array<i64: 10, 1>}, {pipeline_mode = #tpu.pipeline_mode<synchronous>, transform_indices = @transform_5, window_bounds = array<i64: 1, 10>}, {pipeline_mode = #tpu.pipeline_mode<synchronous>, transform_indices = @transform_6, window_bounds = array<i64: 1, 1>}, {transform_indices = @transform_7, window_bounds = array<i64: 1, 128>}]} {
    %c0 = arith.constant 0 : index
    %c0_0 = arith.constant 0 : index
    %0 = vector.load %arg1[%c0, %c0_0] : memref<9x128xf32, #tpu.memory_space<vmem>>, vector<9x128xf32>
    %c0_1 = arith.constant 0 : index
    %c0_2 = arith.constant 0 : index
    %1 = vector.load %arg2[%c0_1, %c0_2] : memref<50x9xf32, #tpu.memory_space<vmem>>, vector<50x9xf32>
    %cst = arith.constant dense<0.000000e+00> : vector<50x128xf32>
    %2 = tpu.matmul %1, %0, %cst {dimension_numbers = #tpu.dot_dimension_numbers<[1], [0], [0], [1], [0, 0, 1, 1], [], []>} : vector<50x9xf32>, vector<9x128xf32>, vector<50x128xf32> -> vector<50x128xf32>
    %c0_3 = arith.constant 0 : index
    %c0_4 = arith.constant 0 : index
    %3 = vector.load %arg3[%c0_3, %c0_4] : memref<50x1xf32, #tpu.memory_space<vmem>>, vector<50x1xf32>
    %4 = vector.broadcast %3 : vector<50x1xf32> to vector<50x128xf32>
    %5 = arith.addf %2, %4 : vector<50x128xf32>
    %cst_5 = arith.constant 0.000000e+00 : f32
    %6 = vector.broadcast %cst_5 : f32 to vector<50x128xf32>
    %7 = arith.maximumf %5, %6 : vector<50x128xf32>
    %c0_6 = arith.constant 0 : index
    %c0_7 = arith.constant 0 : index
    %8 = vector.load %arg4[%c0_6, %c0_7] : memref<10x50xf32, #tpu.memory_space<vmem>>, vector<10x50xf32>
    %cst_8 = arith.constant dense<0.000000e+00> : vector<10x128xf32>
    %9 = tpu.matmul %8, %7, %cst_8 {dimension_numbers = #tpu.dot_dimension_numbers<[1], [0], [0], [1], [0, 0, 1, 1], [], []>} : vector<10x50xf32>, vector<50x128xf32>, vector<10x128xf32> -> vector<10x128xf32>
    %c0_9 = arith.constant 0 : index
    %c0_10 = arith.constant 0 : index
    %10 = vector.load %arg5[%c0_9, %c0_10] : memref<10x1xf32, #tpu.memory_space<vmem>>, vector<10x1xf32>
    %11 = vector.broadcast %10 : vector<10x1xf32> to vector<10x128xf32>
    %12 = arith.addf %9, %11 : vector<10x128xf32>
    %cst_11 = arith.constant 0.000000e+00 : f32
    %13 = vector.broadcast %cst_11 : f32 to vector<10x128xf32>
    %14 = arith.maximumf %12, %13 : vector<10x128xf32>
    %c0_12 = arith.constant 0 : index
    %c0_13 = arith.constant 0 : index
    %15 = vector.load %arg6[%c0_12, %c0_13] : memref<1x10xf32, #tpu.memory_space<vmem>>, vector<1x10xf32>
    %cst_14 = arith.constant dense<0.000000e+00> : vector<1x128xf32>
    %16 = tpu.matmul %15, %14, %cst_14 {dimension_numbers = #tpu.dot_dimension_numbers<[1], [0], [0], [1], [0, 0, 1, 1], [], []>} : vector<1x10xf32>, vector<10x128xf32>, vector<1x128xf32> -> vector<1x128xf32>
    %c0_15 = arith.constant 0 : index
    %c0_16 = arith.constant 0 : index
    %17 = vector.load %arg7[%c0_15, %c0_16] : memref<1x1xf32, #tpu.memory_space<vmem>>, vector<1x1xf32>
    %18 = vector.broadcast %17 : vector<1x1xf32> to vector<1x128xf32>
    %19 = arith.addf %16, %18 : vector<1x128xf32>
    %cst_17 = arith.constant 2.000000e+01 : f32
    %20 = vector.broadcast %cst_17 : f32 to vector<1x128xf32>
    %21 = arith.minimumf %19, %20 : vector<1x128xf32>
    %22 = math.exp %21 : vector<1x128xf32>
    %23 = math.log1p %22 : vector<1x128xf32>
    %cst_18 = arith.constant 2.000000e+01 : f32
    %24 = vector.broadcast %cst_18 : f32 to vector<1x128xf32>
    %25 = arith.cmpf ogt, %19, %24 : vector<1x128xf32>
    %26 = arith.select %25, %19, %23 : vector<1x128xi1>, vector<1x128xf32>
    %c0_19 = arith.constant 0 : index
    %c0_20 = arith.constant 0 : index
    %27 = vector.load %arg8[%c0_19, %c0_20] : memref<1x128xf32, #tpu.memory_space<vmem>>, vector<1x128xf32>
    tpu.vector_store %arg8[%c0_19, %c0_20], %26 {strides = array<i32>} : memref<1x128xf32, #tpu.memory_space<vmem>>, vector<1x128xf32>,
    return
  }
  func.func @transform_0(%arg0: i32) -> (i32, i32) {
    %c0_i32 = arith.constant 0 : i32
    %c0_i32_0 = arith.constant 0 : i32
    return %c0_i32, %arg0 : i32, i32
  }
  func.func @transform_1(%arg0: i32) -> (i32, i32) {
    %c0_i32 = arith.constant 0 : i32
    %c0_i32_0 = arith.constant 0 : i32
    %c0_i32_1 = arith.constant 0 : i32
    return %c0_i32, %c0_i32_0 : i32, i32
  }
  func.func @transform_2(%arg0: i32) -> (i32, i32) {
    %c0_i32 = arith.constant 0 : i32
    %c0_i32_0 = arith.constant 0 : i32
    %c0_i32_1 = arith.constant 0 : i32
    return %c0_i32, %c0_i32_0 : i32, i32
  }
  func.func @transform_3(%arg0: i32) -> (i32, i32) {
    %c0_i32 = arith.constant 0 : i32
    %c0_i32_0 = arith.constant 0 : i32
    %c0_i32_1 = arith.constant 0 : i32
    return %c0_i32, %c0_i32_0 : i32, i32
  }
  func.func @transform_4(%arg0: i32) -> (i32, i32) {
    %c0_i32 = arith.constant 0 : i32
    %c0_i32_0 = arith.constant 0 : i32
    %c0_i32_1 = arith.constant 0 : i32
    return %c0_i32, %c0_i32_0 : i32, i32
  }
  func.func @transform_5(%arg0: i32) -> (i32, i32) {
    %c0_i32 = arith.constant 0 : i32
    %c0_i32_0 = arith.constant 0 : i32
    %c0_i32_1 = arith.constant 0 : i32
    return %c0_i32, %c0_i32_0 : i32, i32
  }
  func.func @transform_6(%arg0: i32) -> (i32, i32) {
    %c0_i32 = arith.constant 0 : i32
    %c0_i32_0 = arith.constant 0 : i32
    %c0_i32_1 = arith.constant 0 : i32
    return %c0_i32, %c0_i32_0 : i32, i32
  }
  func.func @transform_7(%arg0: i32) -> (i32, i32) {
    %c0_i32 = arith.constant 0 : i32
    %c0_i32_0 = arith.constant 0 : i32
    return %c0_i32, %arg0 : i32, i32
  }
}

</mosaic_0001>

<bundles_post_ra>
// kernel: net_forward.1
= control target key start
LH: loop header
LB: loop body
LE: loop exit
PB: predicated region body
PF: predicated region fallthrough
CT: control target
= control target key end

     0   :  { %vm101_vm0 = vcmask 1040384   ;;  %v513_v0 = vmov 0.0   ;;  %vm514_vm1 = vmmov 0   ;;  %vm79_vm2 = vcmask 72704   ;;  %s657_s0 = inlined_call_operand.vmem [shape: f32[9,128], index: 0, kind: input, shape index: {}]   ;;  %s658_s1 = inlined_call_operand.vmem [shape: f32[50,9], index: 1, kind: input, shape index: {}]   ;;  %s659_s6 = inlined_call_operand.<no memory space> [shape: f32[1,1], index: 6, kind: input, shape index: {}]   ;;  %s660_s2 = inlined_call_operand.vmem [shape: f32[50,1], index: 2, kind: input, shape index: {}]   ;;  %s661_s4 = inlined_call_operand.vmem [shape: f32[10,1], index: 4, kind: input, shape index: {}]   ;;  %s662_s3 = inlined_call_operand.vmem [shape: f32[10,50], index: 3, kind: input, shape index: {}]   ;;  %s663_s5 = inlined_call_operand.vmem [shape: f32[1,10], index: 5, kind: input, shape index: {}]   ;;  %s664_s7 = inlined_call_operand.vmem [shape: f32[1,128], index: 7, kind: output, shape index: {}]  }
   0x1   :  { %455 = vmatprep.subr.mxu0 %v513_v0  ;;  %v29_v1 = vld [vmem:[%s657_s0 + $0x8] sm:$0x1]  ;;  %v28_v2 = vld [vmem:[%s657_s0] sm:$0xff]  ;;  %459 = vmatprep.mubr.msk.f32.mxu0 %vm514_vm1, %v513_v0  ;;  %v12_v3 = vstv %s659_s6  ;;  %v515_v5 = vmov 0   ;;  %v43_v6 = vld [vmem:[%s660_s2 + $0x30] sm:$0x3] }
   0x2   :  { %456 = vmatpush3.msk.msra.mxu0 %vm101_vm0, %v29_v1  ;;  %v30_v4 = vld [vmem:[%s658_s1] sm:$0xff]  ;;  %507 = vset.pattern.permute.xlu0 %v515_v5  ;;  %13 = vst [vmem:[#allocation2] sm:$0x1] %v12_v3  ;;  %v31_v8 = vld [vmem:[%s658_s1 + $0x8] sm:$0xff]  ;;  %v40_v10 = vld [vmem:[%s660_s2 + $0x18] sm:$0xff]  ;;  %vm226_vm3 = vcmask 408576  }
   0x3   :  { %457 = vmatprep.subr.mxu0 %v513_v0  ;;  %508 = vset.pattern.permute.xlu1 %v515_v5  ;;  %v41_v7 = vld [vmem:[%s660_s2 + $0x20] sm:$0xff]  ;;  %v42_v9 = vld [vmem:[%s660_s2 + $0x28] sm:$0xff]  ;;  %v32_v11 = vld [vmem:[%s658_s1 + $0x10] sm:$0xff]  ;;  %vm233_vm4 = vcmask 1041408   ;;  %vm325_vm5 = vcmask 80896   ;;  %v321_v5 = vlaneseq }
   0x4   :  { %458 = vmatpush3.msra.mxu0 %v28_v2  ;;  %76 = vperm.xlu0 %507, %v43_v6   ;;  %v39_v12 = vld [vmem:[%s660_s2 + $0x10] sm:$0xff]  ;;  %v38_v13 = vld [vmem:[%s660_s2 + $0x8] sm:$0xff]  ;;  %v33_v14 = vld [vmem:[%s658_s1 + $0x18] sm:$0xff] }
   0x5   :  { %460 = vmatmul.mubr.msk.f32.vlgmr.msra.gmra.mxu0 %vm79_vm2, %v30_v4  ;;  %66 = vperm.xlu1 %508, %v41_v7   ;;  %v37_v15 = vld [vmem:[%s660_s2] sm:$0xff]  ;;  %v215_v16 = vld [vmem:[%s661_s4 + $0x8] sm:$0x3]  ;;  %v36_v21 = vld [vmem:[%s658_s1 + $0x30] sm:$0x3]  ;;  %v322_v6 = vshrl.u32 %v321_v5, 7 }
   0x6   :  { %462 = vmatprep.mubr.msk.f32.mxu0 %vm514_vm1, %v513_v0  ;;  %v34_v17 = vld [vmem:[%s658_s1 + $0x20] sm:$0xff]  ;;  %v35_v20 = vld [vmem:[%s658_s1 + $0x28] sm:$0xff] }
   0x7   :  { %v214_v18 = vld [vmem:[%s661_s4] sm:$0xff]  ;;  %v213_v58 = vld [vmem:[%s662_s3 + $0x8] sm:$0x3]  ;;  %v323_v7 = vsub.s32 0, %v322_v6 }
   0x8   :  { %71 = vperm.xlu0 %507, %v42_v9   ;;  %v212_v22 = vld [vmem:[%s662_s3] sm:$0xff] }
   0x9   :  { %463 = vmatmul.mubr.msk.f32.gmra.mxu0 %vm79_vm2, %v31_v8  ;;  %61 = vperm.xlu1 %508, %v40_v10   ;;  %v315_v19 = vld [vmem:[#allocation2] sm:$0x1] }
   0xa   :  { %465 = vmatprep.mubr.msk.f32.mxu0 %vm514_vm1, %v513_v0  ;;  %494 = vmatprep.mubr.msk.f32.mxu1 %vm226_vm3, %v212_v22  ;;  %v314_v4 = vld [vmem:[%s663_s5] sm:$0x1] }
   0xc   :  { %56 = vperm.xlu0 %507, %v39_v12  }
   0xd   :  { %466 = vmatmul.mubr.msk.f32.gmra.mxu0 %vm79_vm2, %v32_v11  ;;  %51 = vperm.xlu1 %508, %v38_v13  }
   0xe   :  { %468 = vmatprep.mubr.msk.f32.mxu0 %vm514_vm1, %v513_v0 }
  0x10   :  { %46 = vperm.xlu0 %507, %v37_v15  }
  0x11   :  { %469 = vmatmul.mubr.msk.f32.gmra.mxu0 %vm79_vm2, %v33_v14  ;;  %223 = vperm.xlu1 %508, %v215_v16  }
  0x12   :  { %471 = vmatprep.mubr.msk.f32.mxu0 %vm514_vm1, %v513_v0 }
  0x14   :  { %218 = vperm.xlu0 %507, %v214_v18  }
  0x15   :  { %472 = vmatmul.mubr.msk.f32.gmra.mxu0 %vm79_vm2, %v34_v17  ;;  %318 = vperm.xlu1 %508, %v315_v19  }
  0x16   :  { %474 = vmatprep.mubr.msk.f32.mxu0 %vm514_vm1, %v513_v0 }
  0x19   :  { %475 = vmatmul.mubr.msk.f32.gmra.mxu0 %vm79_vm2, %v35_v20 }
  0x1a   :  { %477 = vmatprep.mubr.msk.f32.mxu0 %vm514_vm1, %v513_v0 }
  0x1d   :  { %478 = vmatmul.mubr.msk.f32.gmra.mxu0 %vm79_vm2, %v36_v21 }
  0x7f   :  { %v77_v30 = vpop.permute.xlu0 %76 }
  0x80   :  { %v67_v33 = vpop.permute.xlu1 %66 }
  0x83   :  { %v72_v35 = vpop.permute.xlu0 %71 }
  0x84   :  { %v62_v38 = vpop.permute.xlu1 %61 }
  0x87   :  { %v57_v42 = vpop.permute.xlu0 %56 }
  0x88   :  { %v52_v48 = vpop.permute.xlu1 %51 }
  0x8b   :  { %v47_v51 = vpop.permute.xlu0 %46 }
  0x8c   :  { %v224_v59 = vpop.permute.xlu1 %223 }
  0x8f   :  { %v219_v62 = vpop.permute.xlu0 %218 }
  0x90   :  { %v319_v8 = vpop.permute.xlu1 %318 }
  0x91   :  { %v324_v9 = vrot.slane %v319_v8, %v323_v7 }
  0xc5   :  { %v171_v23 = vpop.f32.mrf.mxu0 }
  0xc6   :  { %v172_v54 = vadd.f32 %v171_v23, %v47_v51 }
  0xc7   :  { %v461_v24 = vpop.f32.mrf.mxu0 }
  0xc8   :  { %v205_v57 = vmax.f32 %v172_v54, 0.0 }
  0xc9   :  { %v176_v25 = vpop.f32.mrf.mxu0 }
  0xca   :  { %v177_v52 = vadd.f32 %v176_v25, %v52_v48 }
  0xcb   :  { %v464_v26 = vpop.f32.mrf.mxu0 }
  0xcc   :  { %v206_v56 = vmax.f32 %v177_v52, 0.0 }
  0xcd   :  { %v181_v27 = vpop.f32.mrf.mxu0 }
  0xce   :  { %v182_v49 = vadd.f32 %v181_v27, %v57_v42 }
  0xcf   :  { %v467_v28 = vpop.f32.mrf.mxu0 }
  0xd0   :  { %v207_v55 = vmax.f32 %v182_v49, 0.0 }
  0xd1   :  { %v186_v29 = vpop.f32.mrf.mxu0 }
  0xd2   :  { %v187_v46 = vadd.f32 %v186_v29, %v62_v38 }
  0xd3   :  { %v470_v31 = vpop.f32.mrf.mxu0 }
  0xd4   :  { %v208_v53 = vmax.f32 %v187_v46, 0.0 }
  0xd5   :  { %v191_v32 = vpop.f32.mrf.mxu0 }
  0xd6   :  { %v192_v44 = vadd.f32 %v191_v32, %v67_v33 }
  0xd7   :  { %v473_v34 = vpop.f32.mrf.mxu0 }
  0xd8   :  { %v209_v50 = vmax.f32 %v192_v44, 0.0 }
  0xd9   :  { %v196_v36 = vpop.f32.mrf.mxu0 }
  0xda   :  { %v197_v40 = vadd.f32 %v196_v36, %v72_v35 }
  0xdb   :  { %v476_v37 = vpop.f32.mrf.mxu0 }
  0xdc   :  { %v210_v47 = vmax.f32 %v197_v40, 0.0 }
  0xdd   :  { %v201_v39 = vpop.f32.mrf.mxu0 }
  0xde   :  { %v202_v41 = vadd.f32 %v201_v39, %v77_v30 }
  0xdf   :  { %v479_v43 = vpop.f32.mrf.mxu0 }
  0xe0   :  { %v211_v45 = vmax.f32 %v202_v41, 0.0 }
  0xe2   :  { %480 = vmatprep.subr.msk.mxu1 %vm233_vm4, %v211_v45 }
  0xe3   :  { %481 = vmatpush3.msk.msra.mxu1 %vm233_vm4, %v211_v45 }
  0xe4   :  { %482 = vmatprep.subr.mxu1 %v210_v47 }
  0xe5   :  { %483 = vmatpush3.msra.mxu1 %v210_v47 }
  0xe6   :  { %484 = vmatprep.subr.mxu1 %v209_v50 }
  0xe7   :  { %485 = vmatpush3.msra.mxu1 %v209_v50 }
  0xe8   :  { %486 = vmatprep.subr.mxu1 %v208_v53 }
  0xe9   :  { %487 = vmatpush3.msra.mxu1 %v208_v53 }
  0xea   :  { %488 = vmatprep.subr.mxu1 %v207_v55 }
  0xeb   :  { %489 = vmatpush3.msra.mxu1 %v207_v55 }
  0xec   :  { %490 = vmatprep.subr.mxu1 %v206_v56 }
  0xed   :  { %491 = vmatpush3.msra.mxu1 %v206_v56 }
  0xee   :  { %492 = vmatprep.subr.mxu1 %v205_v57 }
  0xef   :  { %493 = vmatpush3.msra.mxu1 %v205_v57 }
  0xf0   :  { %495 = vmatmul.mubr.msk.f32.vlgmr.msra.gmra.mxu1 %vm226_vm3, %v213_v58  ;;  %497 = vmatprep.subr.mxu1 %v513_v0 }
  0xf1   :  { %501 = vmatprep.mubr.msk.f32.mxu1 %vm514_vm1, %v513_v0 }
 0x1b0   :  { %v496_v60 = vpop.f32.mrf.mxu1 }
 0x1b1   :  { %v309_v61 = vadd.f32 %v496_v60, %v224_v59 }
 0x1b2   :  { %v303_v63 = vpop.f32.mrf.mxu1 }
 0x1b3   :  { %v313_v1 = vmax.f32 %v309_v61, 0.0  ;;  %v304_v2 = vadd.f32 %v303_v63, %v219_v62 }
 0x1b5   :  { %v312_v3 = vmax.f32 %v304_v2, 0.0  ;;  %498 = vmatpush3.msk.msra.mxu1 %vm233_vm4, %v313_v1 }
 0x1b6   :  { %499 = vmatprep.subr.mxu1 %v513_v0 }
 0x1b7   :  { %500 = vmatpush3.msra.mxu1 %v312_v3 }
 0x1b8   :  { %502 = vmatmul.mubr.msk.f32.vlgmr.msra.gmra.mxu1 %vm325_vm5, %v314_v4 }
 0x278   :  { %v398_v10 = vpop.f32.mrf.mxu1 }
 0x279   :  { %v399_v11 = vadd.f32 %v398_v10, %v324_v9 }
 0x27a   :  { %v503_v12 = vpop.f32.mrf.mxu1 }
 0x27b   :  { %v402_v13 = vmin.f32 %v399_v11, 20.0  ;;  %vm414_vm7 = vcmp.gt.f32.partialorder %v399_v11, 20.0 }
 0x27d   :  { %v403_v14 = vmul.f32 1.442695, %v402_v13 }
 0x27f   :  { %509 = vpow2.f32 %v403_v14 }
 0x28c   :  { %v510_v15 = vpop.eup %509 }
 0x28d   :  { %v405_v16 = vadd.f32 1.0, %v510_v15  ;;  %v408_v17 = vmul.f32 -0.5, %v510_v15  ;;  %v411_v19 = vand.u32 2147483647, %v510_v15 }
 0x28f   :  { %511 = vlog2.f32 %v405_v16  ;;  %v409_v18 = vadd.f32 1.0, %v408_v17  ;;  %vm412_vm6 = vcmp.lt.f32.partialorder %v411_v19, 0.0004427343 }
 0x291   :  { %v410_v21 = vmul.f32 %v510_v15, %v409_v18 }
 0x29c   :  { %v512_v0 = vpop.eup %511 }
 0x29d   :  { %v407_v20 = vmul.f32 0.6931472, %v512_v0 }
 0x29f   :  { %v413_v22 = vsel %vm412_vm6, %v410_v21, %v407_v20 }
 0x2a0   :  { %v415_v23 = vsel %vm414_vm7, %v399_v11, %v413_v22 }
 0x2a1   :  { %416 = vst [vmem:[%s664_s7] sm:$0x1] %v415_v23 }

</bundles_post_ra>
